<compile_context>
chip_gen: v7x
topology: tpu7x:2x2x1
jax: 0.10.0
libtpu: 0.0.40
codegen_flags: <defaults>
</compile_context>

<pallas_src>
import functools
from typing import List, Optional, Tuple

import jax
import jax.numpy as jnp
from jax.experimental import pallas as pl
from jax.experimental.pallas import tpu as pltpu

_LANE = 128
_VMEM_BUDGET = 48 * 1024 * 1024  # conservative: fits v7x's 64 MiB physical VMEM


def _round_up(x: int, m: int) -> int:
    return ((x + m - 1) // m) * m


def _cblinear_kernel(offsets, sizes, x_ref, w_ref, b_ref, *o_refs):
    # x_ref: (Cin, THW) compute dtype     w_ref: (Cout_pad, Cin) compute dtype
    # b_ref: (Cout_pad, 1) f32            o_refs: num_splits x (c_i, THW)
    acc = jnp.dot(w_ref[...], x_ref[...],
                  preferred_element_type=jnp.float32)          # (Cout_pad, THW) f32
    acc = acc + b_ref[...]                                     # f32 bias epilogue
    for off, c, o_ref in zip(offsets, sizes, o_refs):
        # off is a multiple of the sublane tile, so the slice is relayout-free.
        o_ref[...] = acc[off:off + c, :].astype(o_ref.dtype)


def cblinear_forward(x_nchw: jax.Array,
                     weight: jax.Array,        # (Cout_total, Cin, 1, 1) torch Conv2d layout
                     bias: jax.Array,          # (Cout_total,)
                     out_channels: List[int],
                     tile_hw: int = 1024,
                     compute_dtype=jnp.bfloat16,
                     out_dtype=None) -> Tuple[jax.Array, ...]:
    n, cin, h, w = x_nchw.shape
    cout_total = int(sum(out_channels))
    assert weight.shape == (cout_total, cin, 1, 1)
    hw = h * w
    out_dtype = x_nchw.dtype if out_dtype is None else out_dtype
    cbytes = jnp.dtype(compute_dtype).itemsize
    obytes = jnp.dtype(out_dtype).itemsize

    # NCHW -> (N, Cin, H*W): contiguous reshape, no data movement. bf16 cast here.
    x3 = x_nchw.reshape(n, cin, hw).astype(compute_dtype)

    # --- Fused, sublane-padded weight / bias (built once in the wrapper). ---
    pad_mult = 16 if cbytes == 2 else 8           # sublane tile rows per dtype
    w_mat = weight[:, :, 0, 0]                    # (Cout_total, Cin)
    b_f32 = bias.astype(jnp.float32)
    w_chunks, b_chunks, offsets, sizes = [], [], [], []
    src_off, pad_off = 0, 0
    for c in out_channels:
        c_pad = _round_up(c, pad_mult)
        w_chunks.append(jnp.pad(w_mat[src_off:src_off + c, :],
                                ((0, c_pad - c), (0, 0))))
        b_chunks.append(jnp.pad(b_f32[src_off:src_off + c], (0, c_pad - c)))
        offsets.append(pad_off)
        sizes.append(c)
        src_off += c
        pad_off += c_pad
    cout_pad = pad_off
    w_pad = jnp.concatenate(w_chunks, axis=0).astype(compute_dtype)   # (Cout_pad, Cin)
    b_pad = jnp.concatenate(b_chunks, axis=0).reshape(cout_pad, 1)    # (Cout_pad, 1) f32

    # --- Spatial (lane) tile selection + VMEM budget. ---
    if hw <= tile_hw:
        tile_hw = hw                               # full-extent block is always legal
    else:
        tile_hw = _round_up(tile_hw, _LANE)        # ragged last block is clipped

    # v7x megacore: with N == 1 make sure the spatial axis has >= 2 parallel steps.
    if n == 1 and hw > _LANE and pl.cdiv(hw, tile_hw) < 2:
        tile_hw = _round_up(pl.cdiv(hw, 2), _LANE)

    def vmem_estimate(thw: int) -> int:
        est = 2 * cbytes * cin * thw               # x tile (double-buffered)
        est += 2 * cbytes * cout_pad * cin         # weights
        est += 2 * 4 * cout_pad                    # bias (f32)
        est += 2 * obytes * cout_total * thw       # split outputs (double-buffered)
        est += 4 * cout_pad * thw                  # live f32 accumulator
        return est

    while tile_hw > _LANE and vmem_estimate(tile_hw) > _VMEM_BUDGET:
        tile_hw = max(_LANE, _round_up(tile_hw // 2, _LANE))

    vmem_limit = int(min(_VMEM_BUDGET,
                         max(4 * vmem_estimate(tile_hw), 16 * 1024 * 1024)))

    grid = (n, pl.cdiv(hw, tile_hw))

    in_specs = [
        pl.BlockSpec((None, cin, tile_hw), lambda b, j: (b, 0, j)),   # activations
        pl.BlockSpec((cout_pad, cin), lambda b, j: (0, 0)),           # fused weights
        pl.BlockSpec((cout_pad, 1), lambda b, j: (0, 0)),             # fused bias
    ]
    out_shapes = tuple(
        jax.ShapeDtypeStruct((n, c, hw), out_dtype) for c in out_channels)
    out_specs = [
        pl.BlockSpec((None, c, tile_hw), lambda b, j: (b, 0, j))
        for c in out_channels
    ]

    cost = pl.CostEstimate(
        flops=2 * n * hw * cin * cout_total,
        transcendentals=0,
        bytes_accessed=(n * hw * cin * cbytes            # activations in
                        + n * hw * cout_total * obytes   # split outputs
                        + cout_pad * cin * cbytes        # weights
                        + cout_pad * 4),                 # bias
    )

    kernel = functools.partial(_cblinear_kernel, tuple(offsets), tuple(sizes))

    outs = pl.pallas_call(
        kernel,
        out_shape=out_shapes,
        grid_spec=pltpu.PrefetchScalarGridSpec(
            num_scalar_prefetch=0,
            grid=grid,
            in_specs=in_specs,
            out_specs=out_specs,
        ),
        compiler_params=pltpu.CompilerParams(
            dimension_semantics=("parallel", "parallel"),
            vmem_limit_bytes=vmem_limit),
        cost_estimate=cost,
    )(x3, w_pad, b_pad)

    # (N, c, H*W) -> (N, c, H, W): contiguous reshape, free.
    return tuple(o.reshape(n, c, h, w) for o, c in zip(outs, out_channels))


def _reference(x_nchw, weight, bias, out_channels):
    # Plain-JAX fp32 reference: 1x1 conv == einsum over channels, then split.
    y = jnp.einsum("nchw,oc->nohw", x_nchw, weight[:, :, 0, 0]) \
        + bias[None, :, None, None]
    splits, start = [], 0
    for c in out_channels:
        splits.append(y[:, start:start + c, :, :])
        start += c
    return tuple(splits)


if __name__ == "__main__":
    key = jax.random.PRNGKey(0)
    k_x, k_w, k_b = jax.random.split(key, 3)

    # small shapes consistent with the module: batch=2, in_channels=4, spatial=16
    N, Cin, H, W = 2, 4, 16, 16
    out_channels = [4, 8, 16]
    Cout = sum(out_channels)

    x = jax.random.normal(k_x, (N, Cin, H, W), dtype=jnp.float32)
    # Conv2d-shaped parameters: weight (Cout, Cin, 1, 1), bias (Cout,)
    weight = jax.random.normal(k_w, (Cout, Cin, 1, 1), dtype=jnp.float32) * 0.1
    bias = jax.random.normal(k_b, (Cout,), dtype=jnp.float32) * 0.1

    outs = cblinear_forward(x, weight, bias, out_channels)
    outs = jax.block_until_ready(outs)

    refs = _reference(x, weight, bias, out_channels)
    for o, r, c in zip(outs, refs, out_channels):
        assert o.shape == (N, c, H, W), o.shape
        # bf16 matmul (f32 accumulate) vs fp32 reference -> loosened tolerance.
        assert jnp.allclose(o.astype(jnp.float32), r, atol=1e-2, rtol=1e-2)

    print("KERNEL_OK")
</pallas_src>

<mosaic_0001>
module attributes {stable_mosaic.version = 11 : i64} {
  func.func @_cblinear_kernel(%arg0: i32, %arg1: i32, %arg2: memref<1x4x256xbf16, #tpu.memory_space<vmem>>, %arg3: memref<48x4xbf16, #tpu.memory_space<vmem>>, %arg4: memref<48x1xf32, #tpu.memory_space<vmem>>, %arg5: memref<1x4x256xf32, #tpu.memory_space<vmem>>, %arg6: memref<1x8x256xf32, #tpu.memory_space<vmem>>, %arg7: memref<1x16x256xf32, #tpu.memory_space<vmem>>) attributes {dimension_semantics = [#tpu.dimension_semantics<parallel>, #tpu.dimension_semantics<parallel>], iteration_bounds = array<i64: 2, 1>, scalar_prefetch = 0 : i64, scratch_operands = 0 : i64, tpu.core_type = #tpu.core_type<tc>, window_params = [{transform_indices = @transform_0, window_bounds = array<i64: 1, 4, 256>}, {pipeline_mode = #tpu.pipeline_mode<synchronous>, transform_indices = @transform_1, window_bounds = array<i64: 48, 4>}, {pipeline_mode = #tpu.pipeline_mode<synchronous>, transform_indices = @transform_2, window_bounds = array<i64: 48, 1>}, {transform_indices = @transform_3, window_bounds = array<i64: 1, 4, 256>}, {transform_indices = @transform_4, window_bounds = array<i64: 1, 8, 256>}, {transform_indices = @transform_5, window_bounds = array<i64: 1, 16, 256>}]} {
    %c0 = arith.constant 0 : index
    %c0_0 = arith.constant 0 : index
    %0 = vector.load %arg3[%c0, %c0_0] : memref<48x4xbf16, #tpu.memory_space<vmem>>, vector<48x4xbf16>
    %c0_1 = arith.constant 0 : index
    %c0_2 = arith.constant 0 : index
    %c0_3 = arith.constant 0 : index
    %1 = vector.load %arg2[%c0_1, %c0_2, %c0_3] : memref<1x4x256xbf16, #tpu.memory_space<vmem>>, vector<1x4x256xbf16>
    %2 = vector.shape_cast %1 : vector<1x4x256xbf16> to vector<4x256xbf16>
    %cst = arith.constant dense<0.000000e+00> : vector<48x256xf32>
    %3 = tpu.matmul %0, %2, %cst {dimension_numbers = #tpu.dot_dimension_numbers<[1], [0], [0], [1], [0, 0, 1, 1], [], []>} : vector<48x4xbf16>, vector<4x256xbf16>, vector<48x256xf32> -> vector<48x256xf32>
    %c0_4 = arith.constant 0 : index
    %c0_5 = arith.constant 0 : index
    %4 = vector.load %arg4[%c0_4, %c0_5] : memref<48x1xf32, #tpu.memory_space<vmem>>, vector<48x1xf32>
    %5 = vector.broadcast %4 : vector<48x1xf32> to vector<48x256xf32>
    %6 = arith.addf %3, %5 : vector<48x256xf32>
    %7 = vector.extract_strided_slice %6 {offsets = [0, 0], sizes = [4, 256], strides = [1, 1]} : vector<48x256xf32> to vector<4x256xf32>
    %c0_6 = arith.constant 0 : index
    %c0_7 = arith.constant 0 : index
    %c0_8 = arith.constant 0 : index
    %8 = vector.load %arg5[%c0_6, %c0_7, %c0_8] : memref<1x4x256xf32, #tpu.memory_space<vmem>>, vector<1x4x256xf32>
    %9 = vector.shape_cast %8 : vector<1x4x256xf32> to vector<4x256xf32>
    %10 = vector.shape_cast %7 : vector<4x256xf32> to vector<1x4x256xf32>
    tpu.vector_store %arg5[%c0_6, %c0_7, %c0_8], %10 {strides = array<i32>} : memref<1x4x256xf32, #tpu.memory_space<vmem>>, vector<1x4x256xf32>,
    %11 = vector.extract_strided_slice %6 {offsets = [16, 0], sizes = [8, 256], strides = [1, 1]} : vector<48x256xf32> to vector<8x256xf32>
    %c0_9 = arith.constant 0 : index
    %c0_10 = arith.constant 0 : index
    %c0_11 = arith.constant 0 : index
    %12 = vector.load %arg6[%c0_9, %c0_10, %c0_11] : memref<1x8x256xf32, #tpu.memory_space<vmem>>, vector<1x8x256xf32>
    %13 = vector.shape_cast %12 : vector<1x8x256xf32> to vector<8x256xf32>
    %14 = vector.shape_cast %11 : vector<8x256xf32> to vector<1x8x256xf32>
    tpu.vector_store %arg6[%c0_9, %c0_10, %c0_11], %14 {strides = array<i32>} : memref<1x8x256xf32, #tpu.memory_space<vmem>>, vector<1x8x256xf32>,
    %15 = vector.extract_strided_slice %6 {offsets = [32, 0], sizes = [16, 256], strides = [1, 1]} : vector<48x256xf32> to vector<16x256xf32>
    %c0_12 = arith.constant 0 : index
    %c0_13 = arith.constant 0 : index
    %c0_14 = arith.constant 0 : index
    %16 = vector.load %arg7[%c0_12, %c0_13, %c0_14] : memref<1x16x256xf32, #tpu.memory_space<vmem>>, vector<1x16x256xf32>
    %17 = vector.shape_cast %16 : vector<1x16x256xf32> to vector<16x256xf32>
    %18 = vector.shape_cast %15 : vector<16x256xf32> to vector<1x16x256xf32>
    tpu.vector_store %arg7[%c0_12, %c0_13, %c0_14], %18 {strides = array<i32>} : memref<1x16x256xf32, #tpu.memory_space<vmem>>, vector<1x16x256xf32>,
    return
  }
  func.func @transform_0(%arg0: i32, %arg1: i32) -> (i32, i32, i32) {
    %c0_i32 = arith.constant 0 : i32
    %c0_i32_0 = arith.constant 0 : i32
    return %arg0, %c0_i32, %arg1 : i32, i32, i32
  }
  func.func @transform_1(%arg0: i32, %arg1: i32) -> (i32, i32) {
    %c0_i32 = arith.constant 0 : i32
    %c0_i32_0 = arith.constant 0 : i32
    %c0_i32_1 = arith.constant 0 : i32
    return %c0_i32, %c0_i32_0 : i32, i32
  }
  func.func @transform_2(%arg0: i32, %arg1: i32) -> (i32, i32) {
    %c0_i32 = arith.constant 0 : i32
    %c0_i32_0 = arith.constant 0 : i32
    %c0_i32_1 = arith.constant 0 : i32
    return %c0_i32, %c0_i32_0 : i32, i32
  }
  func.func @transform_3(%arg0: i32, %arg1: i32) -> (i32, i32, i32) {
    %c0_i32 = arith.constant 0 : i32
    %c0_i32_0 = arith.constant 0 : i32
    return %arg0, %c0_i32, %arg1 : i32, i32, i32
  }
  func.func @transform_4(%arg0: i32, %arg1: i32) -> (i32, i32, i32) {
    %c0_i32 = arith.constant 0 : i32
    %c0_i32_0 = arith.constant 0 : i32
    return %arg0, %c0_i32, %arg1 : i32, i32, i32
  }
  func.func @transform_5(%arg0: i32, %arg1: i32) -> (i32, i32, i32) {
    %c0_i32 = arith.constant 0 : i32
    %c0_i32_0 = arith.constant 0 : i32
    return %arg0, %c0_i32, %arg1 : i32, i32, i32
  }
}

</mosaic_0001>

<bundles_post_ra>
// kernel: tpu_custom_call.1
= control target key start
LH: loop header
LB: loop body
LE: loop exit
PB: predicated region body
PF: predicated region fallthrough
CT: control target
= control target key end

     0   :  { %s1141_s0 = inlined_call_operand.vmem [shape: bf16[2,4,256], index: 0, kind: input, shape index: {}]   ;;  %s1142_s1 = inlined_call_operand.vmem [shape: bf16[48,4], index: 1, kind: input, shape index: {}]   ;;  %s1143_s2 = inlined_call_operand.vmem [shape: f32[48,1], index: 2, kind: input, shape index: {}]   ;;  %s1144_s3 = inlined_call_operand.hbm [shape: f32[2,4,256], index: 3, kind: output, shape index: {0}]   ;;  %s1145_s4 = inlined_call_operand.hbm [shape: f32[2,8,256], index: 4, kind: output, shape index: {1}]   ;;  %s1146_s5 = inlined_call_operand.hbm [shape: f32[2,16,256], index: 5, kind: output, shape index: {2}]  }
   0x1   :  { %1148 = sst [smem:[#allocation9_spill]] %s1141_s0 }
   0x2   :  { %11 = vsyncpa [#allocation3], 0 }
   0x3   :  { %13 = vsyncpa [#allocation3 + $0x1], 0 }
   0x4   :  { %14 = vsyncpa [#allocation5], 0 }
   0x5   :  { %16 = vsyncpa [#allocation5 + $0x1], 0  ;;  %s919_s18 = smov 0   ;;  %s921_s19 = smov 0  }
   0x6   :  { %s923_s20 = smov 0   ;;  %s925_s21 = smov 0  }
   0x7   :  { %s927_s22 = smov 0   ;;  %s929_s23 = smov 0  }
   0x8 LB: > { %s635_s24 = sadd.s32 4294967295, %s881_s23   ;;  %s1147_s25 = sadd.s32 4294967294, %s881_s23   ;;  %s881_s23 = sphi %s929_s23, %s22_s23   ;;  %s877_s22 = sphi %s927_s22, %s1158_s22   ;;  %s873_s21 = sphi %s925_s21, %s1157_s21   ;;  %s869_s20 = sphi %s923_s20, %s1156_s20   ;;  %s865_s19 = sphi %s921_s19, %s1155_s19   ;;  %s861_s18 = sphi %s919_s18, %s1154_s18  }
   0x9   : > { %s34_s26 = sadd.s32 1, %s877_s22  ;;  %s113_s27 = sadd.s32 1, %s869_s20 }
   0xa   : > { %p36_p0 = scmp.ge.s32.totalorder %s34_s26, 2  ;;  %p123_p1 = scmp.ne.s32.totalorder %s869_s20, %s865_s19 }
   0xb   : > { %p124_p2 = scmp.eq.s32.totalorder %s635_s24, 1  ;;  %p129_p3 = scmp.ne.s32.totalorder %s865_s19, %s861_s18 }
   0xc   : > { %s1160_s26 = smov (%p36_p0, %s34_s26), 0  ;;  %p130_p5 = scmp.eq.s32.totalorder %s1147_s25, 1 }
   0xd   : > { %p961_p4 = por %p124_p2, %p123_p1  ;;  %s108_s29 = ssub.s32 %s877_s22, %s1160_s26 }
   0xe   : > { %p639_p6 = scmp.ge.s32.totalorder %s881_s23, 1  ;;  %p111_p7 = scmp.eq.s32.totalorder %s108_s29, 0 }
   0xf   : > { %p970_p8 = por %p130_p5, %p129_p3  ;;  %p223_p9 = scmp.lt.s32.totalorder %s881_s23, 3 }
  0x10   : > { %s976_s6 = scalar_select %p111_p7, %s869_s20, %s113_s27  }
  0x11   : > { %p224_p10 = pnand %p639_p6, %p223_p9 }
  0x12   : > { %p266_p11 = scmp.lt.s32.totalorder (!%p224_p10), %s873_s21, 1  ;;  %v883_v0 = vmov (!%p224_p10), 0   ;;  %v286_v1 = vld [vmem:[%s1143_s2] sm:$0xff] (!%p224_p10)  ;;  %vm354_vm0 = vcmask (!%p224_p10), 1041408   ;;  %s1151_s0 = sld [smem:[#allocation9_spill]] (!%p224_p10)  ;;  %v288_v3 = vld [vmem:[%s1143_s2 + $0x10] sm:$0xff] (!%p224_p10) }
  0x13   : > { %227 = sbr.rel (%p224_p10) target bundleno = 321 (0x141), region = 32  ;;  %401 = vmatprep.mubr.bf16.mxu1 (!%p224_p10), %v883_v0  ;;  %393 = vmatprep.mubr.bf16.mxu0 (!%p224_p10), %v883_v0  ;;  %v290_v2 = vld [vmem:[%s1143_s2 + $0x20] sm:$0xff] (!%p224_p10)  ;;  %v291_v7 = vld [vmem:[%s1143_s2 + $0x28] sm:$0xff] (!%p224_p10)  ;;  %vm344_vm1 = vcmask (!%p224_p10), 31744   ;;  %v742_v10 = vld [vmem:[%s1142_s1 + $0x10] sm:$0xff] (!%p224_p10)   ;;  %s1005_s13 = sand.u32 (!%p224_p10), 1, %s865_s19  }
  0x14   : > { %738 = vset.pattern.permute.xlu0 (!%p224_p10), %v883_v0  ;;  %739 = vset.pattern.permute.xlu1 (!%p224_p10), %v883_v0  ;;  %v740_v8 = vld [vmem:[%s1142_s1 + $0x8] sm:$0xff] (!%p224_p10)   ;;  %v741_v9 = vld [vmem:[%s1142_s1] sm:$0xff] (!%p224_p10)   ;;  %s641_s14 = sshll.u32 (!%p224_p10), %s1005_s13, 4  ;;  %s640_s16 = sshll.u32 (!%p224_p10), %s1005_s13, 3 }
  0x15   : > { %294 = vperm.xlu0 (!%p224_p10), %738, %v286_v1   ;;  %312 = vperm.xlu1 (!%p224_p10), %739, %v290_v2   ;;  %s666_s17 = sshll.u32 (!%p224_p10), %s873_s21, 8  ;;  %s257_s27 = scalar_lea.vmem (!%p224_p10), [#allocation4], %s641_s14 }
  0x16   : > { %s474_s29 = sshll.u32 (!%p224_p10), %s257_s27, 4  ;;  %s1015_s8 = scalar_lea.vmem (!%p224_p10), [#allocation2], %s640_s16  ;;  %s1023_s29 = int_to_ptr.vmem [resolvable:$true] %s474_s29 }
  0x17   : > { %s458_s9 = sshll.u32 (!%p224_p10), %s1015_s8, 4  ;;  %s1021_s11 = scalar_lea.hbm (!%p224_p10), %s1145_s4, %s666_s17  ;;  %s1033_s9 = int_to_ptr.vmem [resolvable:$true] %s458_s9 }
  0x19   : > { %303 = vperm.xlu0 (!%p224_p10), %738, %v288_v3   ;;  %317 = vperm.xlu1 (!%p224_p10), %739, %v291_v7  }
  0x1a   : > { %s267_s7 = scalar_select %p266_p11, %s873_s21, 1 }
  0x1c   : > { %s664_s10 = sshll.u32 %s267_s7, 2  ;;  %s665_s7 = sshll.u32 %s873_s21, 7 }
  0x1d   : > { %s273_s15 = scalar_lea.vmem %s1151_s0, %s664_s10  ;;  %s1031_s25 = scalar_lea.hbm %s1144_s3, %s665_s7 }
  0x1e   : > { %v648_v4 = vld.sshfl [vmem:[%s273_s15] sm:$0x33 pattern:$0x76325410]  ;;  %s1010_s15 = sand.u32 1, %s635_s24   ;;  %s743_s24 = scalar_lea.vmem %s1023_s29, 256 }
  0x1f   : > { %v343_v5 = vcombine.high %v648_v4, %v648_v4  ;;  %v356_v6 = vsel %vm354_vm0, %v648_v4, 0  ;;  %s437_s17 = scalar_lea.sflag [#allocation5], %s1010_s15  ;;  %p744_p12 = scmp.ne.s32.totalorder %s1023_s29, %s743_s24 }
  0x20   : > { %s884_s10 = smov [#allocation4]  }
  0x21   : > { %668 = vmatprep.subr.msk.bf16.mxu1 %vm354_vm0, %v343_v5  ;;  %649 = vmatprep.subr.msk.bf16.mxu0 %vm354_vm0, %v343_v5  ;;  %p745_p13 = pnand %p744_p12, %p961_p4  ;;  %s747_s0 = sshll.u32 %s884_s10, 4  ;;  %s748_s0 = int_to_ptr.vmem [resolvable:$false] %s747_s0 }
  0x22   : > { %669 = vmatpush1.bf16.msra.mxu1 %v356_v6  ;;  %362 = vmatpush1.bf16.msra.mxu0 %v356_v6  ;;  %p750_p1 = scmp.lt.s32.totalorder %s1023_s29, %s748_s0 }
  0x23   : > { %p746_p0 = pneg %p745_p13 }
  0x25   : > { %651 = vmatmul.mubr.msk.bf16.vlgmr.msra.gmra.mrb[0].mxu1 %vm344_vm1, %v740_v8  ;;  %650 = vmatmul.mubr.msk.bf16.vlgmr.msra.gmra.mrb[0].mxu0 %vm344_vm1, %v741_v9 }
  0x26   : > { %409 = vmatprep.mubr.bf16.mxu1 %v883_v0 }
  0x2d   : > { %652 = vmatmul.mubr.msk.bf16.gmra.mrb[4].mxu1 %vm344_vm1, %v742_v10 }
  0x94   : > { %v295_v11 = vpop.permute.xlu0 %294  ;;  %v1026_v25 = vpop.permute.xlu1 %312 }
  0x98   : > { %v304_v12 = vpop.permute.xlu0 %303 }
  0xf8   : > { %v403_v13 = vpop.f32.mrb[0].mxu1  ;;  %v395_v14 = vpop.f32.mrb[0].mxu0 }
  0xf9   : > { %v404_v15 = vadd.f32 %v403_v13, %v304_v12  ;;  %v405_v16 = vpop.f32.mrb[1].mxu1  ;;  %v396_v17 = vadd.f32 %v395_v14, %v295_v11  ;;  %v397_v18 = vpop.f32.mrb[1].mxu0 }
  0xfa   : > { %v406_v19 = vadd.f32 %v405_v16, %v304_v12  ;;  %v407_v20 = vpop.f32.mrb[2].mxu1  ;;  %v398_v21 = vadd.f32 %v397_v18, %v295_v11  ;;  %v399_v22 = vpop.f32.mrb[2].mxu0 }
  0xfb   : > { %425 = vst [vmem:[%s257_s27] sm:$0xff] %v404_v15  ;;  %v408_v23 = vpop.f32.mrb[3].mxu1  ;;  %v400_v24 = vpop.f32.mrb[3].mxu0 }
  0xfc   : > { %426 = vst [vmem:[%s257_s27 + $0x8] sm:$0xff] %v406_v19  ;;  %v422_v26 = vcombine.low %v396_v17, %v398_v21  ;;  %s749_s27 = scalar_lea.vmem %s748_s0, 512 }
  0xfd   : > { %p751_p2 = scmp.lt.s32.totalorder %s749_s27, %s743_s24 }
  0xff   : > { %p752_p3 = por %p751_p2, %p750_p1 }
 0x101   : > { %p753_p5 = pnand %p752_p3, %p746_p0 }
 0x103   : > { %756 = shalt.err (!%p753_p5)
}
 0x104   : > { %s757_s7 = scalar_lea.hbm %s1021_s11, 256  ;;  %s761_s10 = scalar_lea.hbm %s1145_s4, 512 }
 0x105   : > { %p758_p6 = scmp.ne.s32.totalorder %s1021_s11, %s757_s7  ;;  %p762_p10 = scmp.lt.u32.totalorder %s1021_s11, %s1145_s4 }
 0x106   : > { %p763_p11 = scmp.lt.u32.totalorder %s761_s10, %s757_s7  ;;  %p765_p13 = scmp.lt.u32.totalorder %s757_s7, %s1021_s11 }
 0x107   : > { %p759_p7 = pnand %p758_p6, %p961_p4 }
 0x108   : > { %p764_p12 = por %p763_p11, %p762_p10 }
 0x109   : > { %p760_p9 = pneg %p759_p7 }
 0x10a   : > { %p766_p0 = por %p765_p13, %p764_p12 }
 0x10c   : > { %p767_p1 = pnand %p766_p0, %p760_p9 }
 0x10e   : > { %770 = shalt.err (!%p767_p1)
}
 0x10f   : > { %671 = dma.vmem_to_hbm [thread:$0]  (%p961_p4), %s1023_s29, 256, %s1021_s11, %s437_s17   ;;  %424 = vst [vmem:[%s1015_s8] sm:$0xff] %v422_v26 }
 0x110   : > { %s432_s12 = scalar_lea.sflag [#allocation3], %s1005_s13  ;;  %s771_s24 = scalar_lea.vmem %s1033_s9, 128 }
 0x111   : > { %p772_p2 = scmp.ne.s32.totalorder %s1033_s9, %s771_s24  ;;  %s885_s27 = smov [#allocation2]  }
 0x112   : > { %s775_s7 = sshll.u32 %s885_s27, 4  ;;  %s776_s7 = int_to_ptr.vmem [resolvable:$false] %s775_s7 }
 0x113   : > { %p773_p3 = pnand %p772_p2, %p961_p4  ;;  %s777_s14 = scalar_lea.vmem %s776_s7, 256 }
 0x114   : > { %p778_p6 = scmp.lt.s32.totalorder %s1033_s9, %s776_s7  ;;  %p779_p7 = scmp.lt.s32.totalorder %s777_s14, %s771_s24 }
 0x115   : > { %p774_p5 = pneg %p773_p3 }
 0x116   : > { %p780_p9 = por %p779_p7, %p778_p6 }
 0x118   : > { %p781_p10 = pnand %p780_p9, %p774_p5 }
 0x11a   : > { %784 = shalt.err (!%p781_p10)
}
 0x11b   : > { %s785_s29 = scalar_lea.hbm %s1031_s25, 128  ;;  %s789_s16 = scalar_lea.hbm %s1144_s3, 256 }
 0x11c   : > { %p786_p11 = scmp.ne.s32.totalorder %s1031_s25, %s785_s29  ;;  %p790_p0 = scmp.lt.u32.totalorder %s1031_s25, %s1144_s3 }
 0x11d   : > { %p791_p1 = scmp.lt.u32.totalorder %s789_s16, %s785_s29  ;;  %p793_p3 = scmp.lt.u32.totalorder %s785_s29, %s1031_s25 }
 0x11e   : > { %p787_p12 = pnand %p786_p11, %p961_p4 }
 0x11f   : > { %p792_p2 = por %p791_p1, %p790_p0 }
 0x120   : > { %p788_p13 = pneg %p787_p12 }
 0x121   : > { %p794_p5 = por %p793_p3, %p792_p2 }
 0x123   : > { %p795_p6 = pnand %p794_p5, %p788_p13 }
 0x125   : > { %798 = shalt.err (!%p795_p6)
}
 0x126   : > { %670 = dma.vmem_to_hbm [thread:$0]  (%p961_p4), %s1033_s9, 128, %s1031_s25, %s432_s12   ;;  %v411_v27 = vpop.f32.mrb[4].mxu1  ;;  %v318_v30 = vpop.permute.xlu1 %317 }
 0x127   : > { %s1152_s24 = sshll.u32 %s1005_s13, 5  ;;  %v412_v28 = vadd.f32 %v411_v27, %v1026_v25  ;;  %v413_v29 = vpop.f32.mrb[5].mxu1  ;;  %s667_s14 = sshll.u32 %s873_s21, 9 }
 0x128   : > { %s264_s27 = scalar_lea.vmem [#allocation6], %s1152_s24  ;;  %v414_v31 = vadd.f32 %v413_v29, %v1026_v25  ;;  %v415_v32 = vpop.f32.mrb[6].mxu1  ;;  %s1092_s9 = scalar_lea.hbm %s1146_s5, %s667_s14 }
 0x129   : > { %s489_s7 = sshll.u32 %s264_s27, 4  ;;  %427 = vst [vmem:[%s264_s27] sm:$0xff] %v412_v28  ;;  %v416_v33 = vadd.f32 %v415_v32, %v318_v30  ;;  %v417_v34 = vpop.f32.mrb[7].mxu1  ;;  %s886_s12 = smov [#allocation6]   ;;  %s1087_s7 = int_to_ptr.vmem [resolvable:$true] %s489_s7 }
 0x12a   : > { %428 = vst [vmem:[%s264_s27 + $0x8] sm:$0xff] %v414_v31  ;;  %v418_v35 = vadd.f32 %v417_v34, %v318_v30  ;;  %s799_s21 = scalar_lea.vmem %s1087_s7, 512  ;;  %s803_s29 = sshll.u32 %s886_s12, 4  ;;  %s804_s29 = int_to_ptr.vmem [resolvable:$false] %s803_s29 }
 0x12b   : > { %429 = vst [vmem:[%s264_s27 + $0x10] sm:$0xff] %v416_v33  ;;  %p800_p7 = scmp.ne.s32.totalorder %s1087_s7, %s799_s21  ;;  %s805_s8 = scalar_lea.vmem %s804_s29, 1024 }
 0x12c   : > { %430 = vst [vmem:[%s264_s27 + $0x18] sm:$0xff] %v418_v35  ;;  %p806_p11 = scmp.lt.s32.totalorder %s1087_s7, %s804_s29  ;;  %p807_p12 = scmp.lt.s32.totalorder %s805_s8, %s799_s21 }
 0x12d   : > { %p801_p9 = pnand %p800_p7, %p961_p4 }
 0x12e   : > { %p808_p13 = por %p807_p12, %p806_p11 }
 0x12f   : > { %p802_p10 = pneg %p801_p9 }
 0x131   : > { %p809_p0 = pnand %p808_p13, %p802_p10 }
 0x133   : > { %812 = shalt.err (!%p809_p0)
}
 0x134   : > { %s813_s11 = scalar_lea.hbm %s1092_s9, 512  ;;  %s817_s0 = scalar_lea.hbm %s1146_s5, 1024 }
 0x135   : > { %p814_p1 = scmp.ne.s32.totalorder %s1092_s9, %s813_s11  ;;  %p818_p5 = scmp.lt.u32.totalorder %s1092_s9, %s1146_s5 }
 0x136   : > { %p819_p6 = scmp.lt.u32.totalorder %s817_s0, %s813_s11  ;;  %p821_p9 = scmp.lt.u32.totalorder %s813_s11, %s1092_s9 }
 0x137   : > { %p815_p2 = pnand %p814_p1, %p961_p4 }
 0x138   : > { %p820_p7 = por %p819_p6, %p818_p5 }
 0x139   : > { %p816_p3 = pneg %p815_p2 }
 0x13a   : > { %p822_p10 = por %p821_p9, %p820_p7 }
 0x13c   : > { %p823_p11 = pnand %p822_p10, %p816_p3 }
 0x13e   : > { %826 = shalt.err (!%p823_p11)
}
 0x13f   : > { %s887_s14 = smov 256   ;;  %s888_s25 = smov 16  }
 0x140   : > { %672 = dma.vmem_to_hbm [thread:$0]  (%p961_p4), %s1087_s7, 512, %s1092_s9, %s437_s17, %s887_s14, %s887_s14, %s888_s25  }
 0x141 PF: > { %p686_p12 = scmp.ge.s32.totalorder %s881_s23, 2  ;;  %s504_s13 = sand.u32 1, %s861_s18  }
 0x142   : > { %s505_s21 = scalar_lea.sflag [#allocation3], %s504_s13 }
 0x143   : > { %p677_p13 = pnand %p686_p12, %p970_p8 }
 0x145   : > { %852 = dma.done.wait (!%p677_p13), %s505_s21, 128  }
 0x146   : > { %854 = vsyncadd (!%p677_p13), %s505_s21, 4294967168  ;;  %s1153_s12 = sadd.s32 4294967294, %s881_s23  }
 0x147   : > { %s513_s29 = sand.u32 1, %s1153_s12  }
 0x148   : > { %s514_s8 = scalar_lea.sflag [#allocation5], %s513_s29 }
 0x149   : > { %856 = dma.done.wait (!%p677_p13), %s514_s8, 768  }
 0x14a   : > { %858 = vsyncadd (!%p677_p13), %s514_s8, 4294966528  ;;  %s22_s23 = sadd.s32 1, %s881_s23   ;;  %s1154_s18 = smov %s865_s19 }
 0x14b   : > { %p19_p4 = scmp.ge.s32.totalorder %s22_s23, 4   ;;  %s1155_s19 = smov %s869_s20 }
 0x14c   : > { %s1156_s20 = smov %s976_s6  ;;  %s1157_s21 = smov %s877_s22 }
 0x14d   : > { %s1158_s22 = smov %s1160_s26  ;;  %21 = sbr.rel (!%p19_p4) target bundleno = 8 (0x8), region = 99 }
 0x154   :  { %528 = vsyncpa [#allocation3], 1 }
 0x155   :  { %530 = vsyncpa [#allocation3 + $0x1], 1 }
 0x156   :  { %531 = vsyncpa [#allocation5], 1 }
 0x157   :  { %533 = vsyncpa [#allocation5 + $0x1], 1 }

</bundles_post_ra>
